<compile_context>
chip_gen: v5e
topology: v5e:2x2
jax: 0.10.0
libtpu: 0.0.40
codegen_flags: <defaults>
</compile_context>

<pallas_src>
import functools
import math

import jax
import jax.numpy as jnp
from jax import lax
from jax.experimental import pallas as pl
from jax.experimental.pallas import tpu as pltpu


def _self_attention_kernel(x_ref, wqkv_ref, bqkv_ref, o_ref, qkv_scr,
                           *, scale, d_pad, tq):
    """Blocks: x_ref (1, S, Dp); wqkv_ref (Dp, 3*Dp); bqkv_ref (1, 3*Dp);
    o_ref (1, tq, Dp); qkv_scr (S, 3*Dp) VMEM scratch (persists across qi)."""
    qi = pl.program_id(1)

    # Project Q, K, V for the whole sequence once per batch element with a
    # single fused matmul; reused by every q tile of this batch element.
    @pl.when(qi == 0)
    def _():
        x = x_ref[0]                                          # (S, Dp), native dtype
        qkv = jnp.dot(x, wqkv_ref[...],
                      preferred_element_type=jnp.float32)     # (S, 3*Dp), f32 acc
        qkv += bqkv_ref[...].astype(jnp.float32)
        qkv_scr[...] = qkv.astype(qkv_scr.dtype)

    row0 = pl.multiple_of(qi * tq, tq)
    # Fold the 1/sqrt(D) scaling into Q (cheaper than scaling the (tq, S) scores).
    q = qkv_scr[pl.ds(row0, tq), :d_pad] * scale              # (tq, Dp)
    k = qkv_scr[:, d_pad:2 * d_pad]                           # (S, Dp)
    v = qkv_scr[:, 2 * d_pad:]                                # (S, Dp)

    # QK^T without materializing a transpose: contract the last dims directly.
    scores = lax.dot_general(q, k, (((1,), (1,)), ((), ())),
                             preferred_element_type=jnp.float32)   # (tq, S)

    # Numerically-stable softmax along the key axis (== torch.Softmax(dim=-1)).
    m = jnp.max(scores, axis=-1, keepdims=True)
    p = jnp.exp(scores - m)
    p = p * pl.reciprocal(jnp.sum(p, axis=-1, keepdims=True), approx=True)

    out = jnp.dot(p.astype(v.dtype), v, preferred_element_type=jnp.float32)
    o_ref[0] = out.astype(o_ref.dtype)


def self_attention(x, wq, wk, wv, bq, bk, bv, *, tq=None):
    """x: (B, S, D); wq/wk/wv: (D, D) stored as (in, out); bq/bk/bv: (D,)."""
    B, S, D = x.shape
    assert S % 8 == 0, "sequence length must be a multiple of 8 (sublane)"

    # Pad the feature dim to a lane-dense multiple of 128 (zeros do not change
    # the math: padded weight rows/cols and bias entries are zero).
    d_pad = -(-D // 128) * 128
    pad_d = d_pad - D

    if tq is None:
        tq = min(S, 128)
    assert S % tq == 0
    nq = S // tq

    dt = x.dtype

    def pad_w(w):
        return jnp.pad(w, ((0, pad_d), (0, pad_d))).astype(dt)

    def pad_b(b):
        return jnp.pad(b, (0, pad_d)).astype(dt)

    # Fused QKV weight / bias: one (Dp, 3*Dp) matmul instead of three (Dp, Dp).
    wqkv = jnp.concatenate([pad_w(wq), pad_w(wk), pad_w(wv)], axis=1)
    bqkv = jnp.concatenate([pad_b(bq), pad_b(bk), pad_b(bv)]).reshape(1, 3 * d_pad)
    x_p = jnp.pad(x, ((0, 0), (0, 0), (0, pad_d)))

    scale = 1.0 / math.sqrt(float(D))   # scaling uses the ORIGINAL feature dim

    kernel = functools.partial(_self_attention_kernel,
                               scale=scale, d_pad=d_pad, tq=tq)

    # Grid-invariant operands (weights / bias) have constant index maps, so
    # they are DMA'd only once.  (At large D, pipeline_mode=pl.Buffered(1) on
    # these specs would additionally drop the second VMEM buffer.)
    w_spec = pl.BlockSpec((d_pad, 3 * d_pad), lambda b, qi: (0, 0))
    b_spec = pl.BlockSpec((1, 3 * d_pad), lambda b, qi: (0, 0))
    x_spec = pl.BlockSpec((1, S, d_pad), lambda b, qi: (b, 0, 0))
    o_spec = pl.BlockSpec((1, tq, d_pad), lambda b, qi: (b, qi, 0))

    out = pl.pallas_call(
        kernel,
        out_shape=jax.ShapeDtypeStruct((B, S, d_pad), dt),
        grid_spec=pltpu.PrefetchScalarGridSpec(
            num_scalar_prefetch=0,
            grid=(B, nq),
            in_specs=[x_spec, w_spec, b_spec],
            out_specs=o_spec,
            scratch_shapes=[pltpu.VMEM((S, 3 * d_pad), dt)],
        ),
        compiler_params=pltpu.CompilerParams(
            dimension_semantics=("parallel", "arbitrary"),
            vmem_limit_bytes=48 * 1024 * 1024,
        ),
    )(x_p, wqkv, bqkv)

    return out[..., :D]


def _reference(x, wq, wk, wv, bq, bk, bv):
    q = x @ wq + bq
    k = x @ wk + bk
    v = x @ wv + bv
    s = jnp.einsum("bsd,btd->bst", q, k) / math.sqrt(x.shape[-1])
    p = jax.nn.softmax(s, axis=-1)
    return jnp.einsum("bst,btd->bsd", p, v)


if __name__ == "__main__":
    B, S, D = 2, 8, 32  # small shapes consistent with the module

    key = jax.random.PRNGKey(0)
    kx, kq, kk, kv, kbq, kbk, kbv = jax.random.split(key, 7)

    x = jax.random.normal(kx, (B, S, D), dtype=jnp.float32)

    # nn.Linear(D, D) weights are (out, in); we store the transpose (in, out)
    # so that y = x @ W + b inside the kernel matches x @ weight.T + bias.
    bound = 1.0 / math.sqrt(D)
    wq = jax.random.uniform(kq, (D, D), jnp.float32, -bound, bound)
    wk = jax.random.uniform(kk, (D, D), jnp.float32, -bound, bound)
    wv = jax.random.uniform(kv, (D, D), jnp.float32, -bound, bound)
    bq = jax.random.uniform(kbq, (D,), jnp.float32, -bound, bound)
    bk = jax.random.uniform(kbk, (D,), jnp.float32, -bound, bound)
    bv = jax.random.uniform(kbv, (D,), jnp.float32, -bound, bound)

    out = self_attention(x, wq, wk, wv, bq, bk, bv)
    out = jax.block_until_ready(out)

    ref = _reference(x, wq, wk, wv, bq, bk, bv)
    assert out.shape == (B, S, D)
    # approx=True reciprocal in the softmax -> ~1e-4-level relative diffs.
    assert jnp.allclose(out, ref, atol=2e-3, rtol=2e-3), "mismatch vs reference"

    print("KERNEL_OK")
</pallas_src>

<mosaic_0001>
module attributes {stable_mosaic.version = 11 : i64} {
  func.func @_self_attention_kernel(%arg0: i32, %arg1: i32, %arg2: memref<1x8x128xf32, #tpu.memory_space<vmem>>, %arg3: memref<128x384xf32, #tpu.memory_space<vmem>>, %arg4: memref<1x384xf32, #tpu.memory_space<vmem>>, %arg5: memref<1x8x128xf32, #tpu.memory_space<vmem>>, %arg6: memref<8x384xf32, #tpu.memory_space<vmem>>) attributes {dimension_semantics = [#tpu.dimension_semantics<parallel>, #tpu.dimension_semantics<arbitrary>], iteration_bounds = array<i64: 2, 1>, scalar_prefetch = 0 : i64, scratch_operands = 1 : i64, tpu.core_type = #tpu.core_type<tc>, window_params = [{transform_indices = @transform_0, window_bounds = array<i64: 1, 8, 128>}, {pipeline_mode = #tpu.pipeline_mode<synchronous>, transform_indices = @transform_1, window_bounds = array<i64: 128, 384>}, {pipeline_mode = #tpu.pipeline_mode<synchronous>, transform_indices = @transform_2, window_bounds = array<i64: 1, 384>}, {transform_indices = @transform_3, window_bounds = array<i64: 1, 8, 128>}]} {
    %c0_i32 = arith.constant 0 : i32
    %0 = arith.cmpi eq, %arg1, %c0_i32 : i32
    %1 = arith.extui %0 : i1 to i32
    %c0_i32_0 = arith.constant 0 : i32
    %2 = arith.cmpi ne, %1, %c0_i32_0 : i32
    scf.if %2 {
      %c0_10 = arith.constant 0 : index
      %c0_11 = arith.constant 0 : index
      %c0_12 = arith.constant 0 : index
      %26 = vector.load %arg2[%c0_10, %c0_11, %c0_12] : memref<1x8x128xf32, #tpu.memory_space<vmem>>, vector<1x8x128xf32>
      %27 = vector.shape_cast %26 : vector<1x8x128xf32> to vector<8x128xf32>
      %c0_13 = arith.constant 0 : index
      %c0_14 = arith.constant 0 : index
      %28 = vector.load %arg3[%c0_13, %c0_14] : memref<128x384xf32, #tpu.memory_space<vmem>>, vector<128x384xf32>
      %cst_15 = arith.constant dense<0.000000e+00> : vector<8x384xf32>
      %29 = tpu.matmul %27, %28, %cst_15 {dimension_numbers = #tpu.dot_dimension_numbers<[1], [0], [0], [1], [0, 0, 1, 1], [], []>} : vector<8x128xf32>, vector<128x384xf32>, vector<8x384xf32> -> vector<8x384xf32>
      %c0_16 = arith.constant 0 : index
      %c0_17 = arith.constant 0 : index
      %30 = vector.load %arg4[%c0_16, %c0_17] : memref<1x384xf32, #tpu.memory_space<vmem>>, vector<1x384xf32>
      %31 = vector.broadcast %30 : vector<1x384xf32> to vector<8x384xf32>
      %32 = arith.addf %29, %31 : vector<8x384xf32>
      %c0_18 = arith.constant 0 : index
      %c0_19 = arith.constant 0 : index
      %33 = vector.load %arg6[%c0_18, %c0_19] : memref<8x384xf32, #tpu.memory_space<vmem>>, vector<8x384xf32>
      tpu.vector_store %arg6[%c0_18, %c0_19], %32 {strides = array<i32>} : memref<8x384xf32, #tpu.memory_space<vmem>>, vector<8x384xf32>,
    } else {
    }
    %c8_i32 = arith.constant 8 : i32
    %3 = arith.muli %arg1, %c8_i32 : i32
    %4 = tpu.assume_multiple %3, 8 : i32
    %5 = arith.index_cast %4 : i32 to index
    %c0 = arith.constant 0 : index
    %6 = vector.load %arg6[%5, %c0] : memref<8x384xf32, #tpu.memory_space<vmem>>, vector<8x128xf32>
    %cst = arith.constant 0.176776692 : f32
    %7 = vector.broadcast %cst : f32 to vector<8x128xf32>
    %8 = arith.mulf %6, %7 : vector<8x128xf32>
    %c0_1 = arith.constant 0 : index
    %c128 = arith.constant 128 : index
    %9 = vector.load %arg6[%c0_1, %c128] : memref<8x384xf32, #tpu.memory_space<vmem>>, vector<8x128xf32>
    %c0_2 = arith.constant 0 : index
    %c256 = arith.constant 256 : index
    %10 = vector.load %arg6[%c0_2, %c256] : memref<8x384xf32, #tpu.memory_space<vmem>>, vector<8x128xf32>
    %cst_3 = arith.constant dense<0.000000e+00> : vector<8x8xf32>
    %11 = tpu.matmul %8, %9, %cst_3 {dimension_numbers = #tpu.dot_dimension_numbers<[1], [1], [0], [0], [0, 0, 1, 0], [], []>} : vector<8x128xf32>, vector<8x128xf32>, vector<8x8xf32> -> vector<8x8xf32>
    %cst_4 = arith.constant dense<0xFF800000> : vector<8xf32>
    %12 = vector.multi_reduction <maximumf>, %11, %cst_4 [1] : vector<8x8xf32> to vector<8xf32>
    %13 = vector.shape_cast %12 : vector<8xf32> to vector<8x1xf32>
    %14 = vector.broadcast %13 : vector<8x1xf32> to vector<8x8xf32>
    %15 = arith.subf %11, %14 : vector<8x8xf32>
    %16 = math.exp %15 : vector<8x8xf32>
    %cst_5 = arith.constant dense<0.000000e+00> : vector<8xf32>
    %17 = vector.multi_reduction <add>, %16, %cst_5 [1] : vector<8x8xf32> to vector<8xf32>
    %18 = vector.shape_cast %17 : vector<8xf32> to vector<8x1xf32>
    %19 = tpu.reciprocal %18 {approx = true} : vector<8x1xf32> -> vector<8x1xf32>
    %20 = vector.broadcast %19 : vector<8x1xf32> to vector<8x8xf32>
    %21 = arith.mulf %16, %20 : vector<8x8xf32>
    %cst_6 = arith.constant dense<0.000000e+00> : vector<8x128xf32>
    %22 = tpu.matmul %21, %10, %cst_6 {dimension_numbers = #tpu.dot_dimension_numbers<[1], [0], [0], [1], [0, 0, 1, 1], [], []>} : vector<8x8xf32>, vector<8x128xf32>, vector<8x128xf32> -> vector<8x128xf32>
    %c0_7 = arith.constant 0 : index
    %c0_8 = arith.constant 0 : index
    %c0_9 = arith.constant 0 : index
    %23 = vector.load %arg5[%c0_7, %c0_8, %c0_9] : memref<1x8x128xf32, #tpu.memory_space<vmem>>, vector<1x8x128xf32>
    %24 = vector.shape_cast %23 : vector<1x8x128xf32> to vector<8x128xf32>
    %25 = vector.shape_cast %22 : vector<8x128xf32> to vector<1x8x128xf32>
    tpu.vector_store %arg5[%c0_7, %c0_8, %c0_9], %25 {strides = array<i32>} : memref<1x8x128xf32, #tpu.memory_space<vmem>>, vector<1x8x128xf32>,
    return
  }
  func.func @transform_0(%arg0: i32, %arg1: i32) -> (i32, i32, i32) {
    %c0_i32 = arith.constant 0 : i32
    %c0_i32_0 = arith.constant 0 : i32
    %c0_i32_1 = arith.constant 0 : i32
    return %arg0, %c0_i32, %c0_i32_0 : i32, i32, i32
  }
  func.func @transform_1(%arg0: i32, %arg1: i32) -> (i32, i32) {
    %c0_i32 = arith.constant 0 : i32
    %c0_i32_0 = arith.constant 0 : i32
    %c0_i32_1 = arith.constant 0 : i32
    return %c0_i32, %c0_i32_0 : i32, i32
  }
  func.func @transform_2(%arg0: i32, %arg1: i32) -> (i32, i32) {
    %c0_i32 = arith.constant 0 : i32
    %c0_i32_0 = arith.constant 0 : i32
    %c0_i32_1 = arith.constant 0 : i32
    return %c0_i32, %c0_i32_0 : i32, i32
  }
  func.func @transform_3(%arg0: i32, %arg1: i32) -> (i32, i32, i32) {
    %c0_i32 = arith.constant 0 : i32
    %c0_i32_0 = arith.constant 0 : i32
    return %arg0, %arg1, %c0_i32 : i32, i32, i32
  }
}

</mosaic_0001>

<bundles_post_ra>
// kernel: tpu_custom_call.1
= control target key start
LH: loop header
LB: loop body
LE: loop exit
PB: predicated region body
PF: predicated region fallthrough
CT: control target
= control target key end

     0   :  { %8 = vsyncpa [#allocation4], 0  ;;  %s1003_s0 = inlined_call_operand.hbm [shape: f32[2,8,128], index: 0, kind: input, shape index: {}]   ;;  %s1004_s1 = inlined_call_operand.hbm [shape: f32[128,384], index: 1, kind: input, shape index: {}]   ;;  %s1005_s2 = inlined_call_operand.hbm [shape: f32[1,384], index: 2, kind: input, shape index: {}]   ;;  %s1006_s3 = inlined_call_operand.hbm [shape: f32[2,8,128], index: 3, kind: output, shape index: {}]  }
   0x1   :  { %10 = vsyncpa [#allocation4 + $0x1], 0 }
   0x2   :  { %11 = vsyncpa [#allocation7], 0 }
   0x3   :  { %12 = vsyncpa [#allocation5], 0 }
   0x4   :  { %14 = vsyncpa [#allocation5 + $0x1], 0  ;;  %s849_s12 = smov 0   ;;  %s851_s13 = smov 0  }
   0x5   :  { %s853_s14 = smov 0   ;;  %s855_s15 = smov 0  }
   0x6   :  { %s857_s16 = smov 0   ;;  %s859_s17 = smov 0  }
   0x7 LB: > { %s540_s18 = sadd.s32 4294967295, %s823_s17   ;;  %p542_p0 = scmp.ge.s32.totalorder %s823_s17, 1  ;;  %s823_s17 = sphi %s859_s17, %s20_s17   ;;  %s819_s16 = sphi %s857_s16, %s1016_s16   ;;  %s815_s15 = sphi %s855_s15, %s1015_s15   ;;  %s811_s14 = sphi %s853_s14, %s1014_s14   ;;  %s807_s13 = sphi %s851_s13, %s1013_s13   ;;  %s803_s12 = sphi %s849_s12, %s1012_s12  }
   0x8   : > { %p883_p1 = scmp.eq.s32.totalorder %s540_s18, 0  ;;  %p133_p2 = scmp.lt.s32.totalorder %s823_s17, 3 }
   0x9   : > { %s144_s22 = sshll.u32 %s1004_s1, 4  ;;  %s825_s24 = smov [#allocation6]   ;;  %s145_s22 = int_to_ptr.hbm [resolvable:$true] %s144_s22 }
   0xa   : > { %p891_p3 = pnand %p542_p0, %p133_p2  ;;  %s146_s25 = sshll.u32 %s825_s24, 4  ;;  %s147_s25 = int_to_ptr.vmem [resolvable:$true] %s146_s25 }
   0xb   : > { %p545_p6 = scmp.ge.s32.totalorder %s823_s17, 2  ;;  %s159_s28 = sshll.u32 %s1005_s2, 4  ;;  %s160_s28 = int_to_ptr.hbm [resolvable:$true] %s159_s28 }
   0xc   : > { %p570_p4 = pneg %p891_p3  ;;  %s826_s29 = smov 384  }
   0xd   : > { %s827_s30 = smov 24   ;;  %s828_s4 = smov [#allocation8]  }
   0xe   : > { %p571_p5 = pnand %p570_p4, %p883_p1  ;;  %s161_s5 = sshll.u32 %s828_s4, 4  ;;  %s162_s5 = int_to_ptr.vmem [resolvable:$true] %s161_s5 }
   0xf   : > { %s32_s6 = sadd.s32 1, %s819_s16  ;;  %s541_s7 = sadd.s32 4294967294, %s823_s17  }
  0x10   : > { %573 = dma.hbm_to_vmem [thread:$0]  (!%p571_p5), %s145_s22, 6144, %s147_s25, [#allocation7], %s826_s29, %s826_s29, %s827_s30  }
  0x11   : > { %576 = dma.hbm_to_vmem [thread:$0]  (!%p571_p5), %s160_s28, 48, %s162_s5, [#allocation7]  }
  0x12   : > { %p34_p7 = scmp.ge.s32.totalorder %s32_s6, 2  ;;  %s39_s8 = sadd.s32 1, %s811_s14 }
  0x13   : > { %p46_p8 = scmp.ne.s32.totalorder %s811_s14, %s807_s13  ;;  %p47_p9 = scmp.eq.s32.totalorder %s823_s17, 0 }
  0x14   : > { %s1018_s6 = smov (%p34_p7, %s32_s6), 0  ;;  %p52_p10 = scmp.ne.s32.totalorder %s807_s13, %s803_s12 }
  0x15   : > { %s36_s9 = ssub.s32 %s819_s16, %s1018_s6  ;;  %p120_p11 = scmp.eq.s32.totalorder %s540_s18, 1 }
  0x16   : > { %p37_p12 = scmp.eq.s32.totalorder %s36_s9, 0  ;;  %p919_p13 = por %p883_p1, %p52_p10 }
  0x17   : > { %p923_p0 = por %p120_p11, %p46_p8  ;;  %p126_p2 = scmp.eq.s32.totalorder %s541_s7, 1 }
  0x18   : > { %s928_s20 = scalar_select %p37_p12, %s811_s14, %s39_s8  }
  0x19   : > { %p48_p4 = por %p47_p9, %p46_p8  ;;  %p930_p5 = por %p126_p2, %p52_p10 }
  0x1a   : > { %s172_s22 = sand.u32 1, %s811_s14   ;;  %s547_s18 = sshll.u32 %s819_s16, 3 }
  0x1b   : > { %p587_p7 = scmp.lt.s32.totalorder %s823_s17, 2  ;;  %s546_s24 = sshll.u32 %s172_s22, 3 }
  0x1c   : > { %s180_s27 = scalar_lea.hbm %s1003_s0, %s547_s18  ;;  %s176_s29 = scalar_lea.vmem [#allocation3], %s546_s24 }
  0x1d   : > { %s182_s28 = sshll.u32 %s180_s27, 4  ;;  %s184_s30 = sshll.u32 %s176_s29, 4  ;;  %s183_s28 = int_to_ptr.hbm [resolvable:$true] %s182_s28  ;;  %s185_s30 = int_to_ptr.vmem [resolvable:$true] %s184_s30 }
  0x1e   : > { %p578_p11 = pnand %p587_p7, %p48_p4  ;;  %s173_s4 = scalar_lea.sflag [#allocation4], %s172_s22 }
  0x1f   : > { %193 = sbr.rel (%p891_p3) target bundleno = 723 (0x2d3), region = 32  ;;  %s943_s5 = sand.u32 (!%p891_p3), 1, %s807_s13  }
  0x20   : > { %580 = dma.hbm_to_vmem [thread:$0]  (!%p578_p11), %s183_s28, 128, %s185_s30, %s173_s4  }
  0x21   : > { %s549_s7 = sshll.u32 (!%p891_p3), %s943_s5, 3  ;;  %s196_s8 = scalar_lea.sflag (!%p891_p3), [#allocation4], %s943_s5 }
  0x22   : > { %s949_s9 = scalar_lea.vmem (!%p891_p3), [#allocation3], %s549_s7 }
  0x24   : > { %790 = dma.done.wait (%p919_p13), %s196_s8, 128  }
  0x25   : > { %792 = vsyncadd (%p919_p13), %s196_s8, 4294967168 }
  0x26   : > { %794 = dma.done.wait (%p883_p1), [#allocation7], 6192  }
  0x27   : > { %796 = vsyncadd (%p883_p1), [#allocation7], 4294961104  ;;  %v284_v0 = vld [vmem:[#allocation6 + $0x170] sm:$0xff]  ;;  %v283_v1 = vld [vmem:[#allocation6 + $0x168] sm:$0xff]  ;;  %vm387_vm0 = vcmask 64512   ;;  %s555_s19 = sshll.u32 %s815_s15, 3 }
  0x28   : > { %v281_v2 = vld [vmem:[#allocation6 + $0x158] sm:$0xff]  ;;  %314 = vmatpush.msra.mxu1 %v284_v0  ;;  %294 = vmatpush.msra.mxu0 %v283_v1  ;;  %v280_v3 = vld [vmem:[#allocation6 + $0x150] sm:$0xff]  ;;  %v278_v4 = vld [vmem:[#allocation6 + $0x140] sm:$0xff]  ;;  %s435_s22 = scalar_lea.hbm %s1006_s3, %s555_s19  ;;  %s232_s18 = scalar_lea.vmem [#allocation9], %s549_s7 }
  0x29   : > { %v277_v5 = vld [vmem:[#allocation6 + $0x138] sm:$0xff]  ;;  %v275_v6 = vld [vmem:[#allocation6 + $0x128] sm:$0xff]  ;;  %v274_v7 = vld [vmem:[#allocation6 + $0x120] sm:$0xff]  ;;  %s437_s24 = sshll.u32 %s232_s18, 4  ;;  %s439_s25 = sshll.u32 %s435_s22, 4  ;;  %s438_s24 = int_to_ptr.vmem [resolvable:$true] %s437_s24  ;;  %s440_s25 = int_to_ptr.hbm [resolvable:$true] %s439_s25 }
  0x2a   : > { %315 = vmatpush.msra.mxu1 %v281_v2  ;;  %295 = vmatpush.msra.mxu0 %v280_v3  ;;  %v272_v8 = vld [vmem:[#allocation6 + $0x110] sm:$0xff]  ;;  %v271_v9 = vld [vmem:[#allocation6 + $0x108] sm:$0xff]  ;;  %v269_v10 = vld [vmem:[#allocation6 + $0xf8] sm:$0xff]  ;;  %s424_s26 = scalar_lea.sflag [#allocation5], %s943_s5  ;;  %s751_s27 = sshra.s32 %s440_s25, 4  ;;  %s752_s27 = int_to_ptr.hbm [resolvable:$true] %s751_s27 }
  0x2b   : > { %v268_v11 = vld [vmem:[#allocation6 + $0xf0] sm:$0xff]  ;;  %v266_v12 = vld [vmem:[#allocation6 + $0xe0] sm:$0xff]  ;;  %v265_v13 = vld [vmem:[#allocation6 + $0xd8] sm:$0xff]  ;;  %s753_s28 = scalar_lea.hbm %s752_s27, 8  ;;  %s757_s30 = scalar_lea.hbm %s1006_s3, 16 }
  0x2c   : > { %316 = vmatpush.msra.mxu1 %v278_v4  ;;  %296 = vmatpush.msra.mxu0 %v277_v5  ;;  %v263_v14 = vld [vmem:[#allocation6 + $0xc8] sm:$0xff]  ;;  %v262_v15 = vld [vmem:[#allocation6 + $0xc0] sm:$0xff]  ;;  %v260_v16 = vld [vmem:[#allocation6 + $0xb0] sm:$0xff]  ;;  %p754_p1 = scmp.ne.s32.totalorder %s752_s27, %s753_s28  ;;  %p758_p9 = scmp.lt.s32.totalorder %s752_s27, %s1006_s3 }
  0x2d   : > { %v259_v17 = vld [vmem:[#allocation6 + $0xa8] sm:$0xff]  ;;  %v257_v18 = vld [vmem:[#allocation6 + $0x98] sm:$0xff]  ;;  %v256_v19 = vld [vmem:[#allocation6 + $0x90] sm:$0xff]  ;;  %p759_p10 = scmp.lt.s32.totalorder %s757_s30, %s753_s28 }
  0x2e   : > { %317 = vmatpush.msra.mxu1 %v275_v6  ;;  %297 = vmatpush.msra.mxu0 %v274_v7  ;;  %v254_v20 = vld [vmem:[#allocation6 + $0x80] sm:$0xff]  ;;  %v253_v21 = vld [vmem:[#allocation6 + $0x78] sm:$0xff]  ;;  %v251_v22 = vld [vmem:[#allocation6 + $0x68] sm:$0xff]  ;;  %p755_p3 = pnand %p754_p1, %p923_p0 }
  0x2f   : > { %v250_v23 = vld [vmem:[#allocation6 + $0x60] sm:$0xff]  ;;  %v248_v24 = vld [vmem:[#allocation6 + $0x50] sm:$0xff]  ;;  %v247_v25 = vld [vmem:[#allocation6 + $0x48] sm:$0xff]  ;;  %p760_p12 = por %p759_p10, %p758_p9 }
  0x30   : > { %318 = vmatpush.msra.mxu1 %v272_v8  ;;  %298 = vmatpush.msra.mxu0 %v271_v9  ;;  %v245_v26 = vld [vmem:[#allocation6 + $0x38] sm:$0xff]  ;;  %v244_v27 = vld [vmem:[#allocation6 + $0x30] sm:$0xff]  ;;  %v242_v28 = vld [vmem:[#allocation6 + $0x20] sm:$0xff]  ;;  %p756_p8 = pneg %p755_p3 }
  0x31   : > { %v241_v29 = vld [vmem:[#allocation6 + $0x18] sm:$0xff]  ;;  %v239_v30 = vld [vmem:[#allocation6 + $0x8] sm:$0xff]  ;;  %v238_v31 = vld [vmem:[#allocation6] sm:$0xff] }
  0x32   : > { %319 = vmatpush.msra.mxu1 %v269_v10  ;;  %299 = vmatpush.msra.mxu0 %v268_v11  ;;  %v237_v32 = vld [vmem:[%s949_s9] sm:$0xff]  ;;  %v286_v33 = vld [vmem:[#allocation8] sm:$0x7]  ;;  %v279_v43 = vld [vmem:[#allocation6 + $0x148] sm:$0xff]  ;;  %p761_p13 = pnand %p760_p12, %p756_p8 }
  0x33   : > { %v288_v34 = vperm.slane %v286_v33, 0  ;;  %v289_v35 = vperm.slane %v286_v33, 1  ;;  %v285_v41 = vld [vmem:[#allocation6 + $0x178] sm:$0xff]  ;;  %v282_v42 = vld [vmem:[#allocation6 + $0x160] sm:$0xff]  ;;  %v276_v44 = vld [vmem:[#allocation6 + $0x130] sm:$0xff]  ;;  %v290_v0 = vperm.slane %v286_v33, 2 }
  0x34   : > { %320 = vmatpush.msra.mxu1 %v266_v12  ;;  %300 = vmatpush.msra.mxu0 %v265_v13  ;;  %v273_v45 = vld [vmem:[#allocation6 + $0x118] sm:$0xff]  ;;  %v270_v46 = vld [vmem:[#allocation6 + $0x100] sm:$0xff]  ;;  %v267_v47 = vld [vmem:[#allocation6 + $0xe8] sm:$0xff] }
  0x35   : > { %334 = vmatpush.msra.mxu2 %v285_v41  ;;  %v264_v48 = vld [vmem:[#allocation6 + $0xd0] sm:$0xff]  ;;  %v261_v49 = vld [vmem:[#allocation6 + $0xb8] sm:$0xff]  ;;  %v258_v50 = vld [vmem:[#allocation6 + $0xa0] sm:$0xff] }
  0x36   : > { %321 = vmatpush.msra.mxu1 %v263_v14  ;;  %301 = vmatpush.msra.mxu0 %v262_v15  ;;  %v255_v51 = vld [vmem:[#allocation6 + $0x88] sm:$0xff]  ;;  %v252_v52 = vld [vmem:[#allocation6 + $0x70] sm:$0xff]  ;;  %v249_v53 = vld [vmem:[#allocation6 + $0x58] sm:$0xff] }
  0x37   : > { %335 = vmatpush.msra.mxu2 %v282_v42  ;;  %v246_v54 = vld [vmem:[#allocation6 + $0x40] sm:$0xff]  ;;  %v243_v55 = vld [vmem:[#allocation6 + $0x28] sm:$0xff]  ;;  %v240_v56 = vld [vmem:[#allocation6 + $0x10] sm:$0xff] }
  0x38   : > { %322 = vmatpush.msra.mxu1 %v260_v16  ;;  %302 = vmatpush.msra.mxu0 %v259_v17 }
  0x39   : > { %336 = vmatpush.msra.mxu2 %v279_v43 }
  0x3a   : > { %323 = vmatpush.msra.mxu1 %v257_v18  ;;  %303 = vmatpush.msra.mxu0 %v256_v19 }
  0x3b   : > { %337 = vmatpush.msra.mxu2 %v276_v44 }
  0x3c   : > { %324 = vmatpush.msra.mxu1 %v254_v20  ;;  %304 = vmatpush.msra.mxu0 %v253_v21 }
  0x3d   : > { %338 = vmatpush.msra.mxu2 %v273_v45 }
  0x3e   : > { %325 = vmatpush.msra.mxu1 %v251_v22  ;;  %305 = vmatpush.msra.mxu0 %v250_v23 }
  0x3f   : > { %339 = vmatpush.msra.mxu2 %v270_v46 }
  0x40   : > { %326 = vmatpush.msra.mxu1 %v248_v24  ;;  %306 = vmatpush.msra.mxu0 %v247_v25 }
  0x41   : > { %340 = vmatpush.msra.mxu2 %v267_v47 }
  0x42   : > { %327 = vmatpush.msra.mxu1 %v245_v26  ;;  %307 = vmatpush.msra.mxu0 %v244_v27 }
  0x43   : > { %341 = vmatpush.msra.mxu2 %v264_v48 }
  0x44   : > { %328 = vmatpush.msra.mxu1 %v242_v28  ;;  %308 = vmatpush.msra.mxu0 %v241_v29 }
  0x45   : > { %342 = vmatpush.msra.mxu2 %v261_v49 }
  0x46   : > { %329 = vmatpush.msra.mxu1 %v239_v30  ;;  %309 = vmatpush.msra.mxu0 %v238_v31 }
  0x47   : > { %330 = vmatmul.f32.vlgmr.msra.gmra.mxu1 %v237_v32  ;;  %310 = vmatmul.f32.vlgmr.msra.gmra.mxu0 %v237_v32 }
  0x48   : > { %343 = vmatpush.msra.mxu2 %v258_v50 }
  0x4a   : > { %344 = vmatpush.msra.mxu2 %v255_v51 }
  0x4c   : > { %345 = vmatpush.msra.mxu2 %v252_v52 }
  0x4e   : > { %346 = vmatpush.msra.mxu2 %v249_v53 }
  0x50   : > { %347 = vmatpush.msra.mxu2 %v246_v54 }
  0x52   : > { %348 = vmatpush.msra.mxu2 %v243_v55 }
  0x54   : > { %349 = vmatpush.msra.mxu2 %v240_v56 }
  0x55   : > { %350 = vmatmul.f32.vlgmr.msra.gmra.mxu2 %v237_v32 }
  0xc4   : > { %v331_v36 = vpop.f32.mrf.mxu1  ;;  %v311_v37 = vpop.f32.mrf.mxu0 }
  0xc5   : > { %v312_v38 = vadd.f32 %v311_v37, %v288_v34  ;;  %v332_v39 = vadd.f32 %v331_v36, %v289_v35 }
  0xc7   : > { %v364_v40 = vmul.f32 0.17677669, %v312_v38  ;;  %382 = vmatpush.xpose.msra.mxu3 %v332_v39 }
  0xca   : > { %383 = vmatmul.f32.vlgmr.msra.gmra.mxu3 %v364_v40 }
  0xd8   : > { %v351_v1 = vpop.f32.mrf.mxu2 }
  0xd9   : > { %v352_v2 = vadd.f32 %v351_v1, %v290_v0 }
  0xdb   : > { %417 = vmatpush.msrb.mxu3 %v352_v2 }
 0x14d   : > { %v384_v57 = vpop.f32.mrf.mxu3 }
 0x14e   : > { %v388_v58 = vsel %vm387_vm0, %v384_v57, -inf }
 0x14f   : > { %389 = vmax.xlane.f32.xlu0 %v388_v58 }
 0x1c2   : > { %v390_v59 = vpop.xlane.xlu0 %389 }
 0x1c3   : > { %v391_v60 = vsub.f32 %v384_v57, %v390_v59 }
 0x1c5   : > { %v392_v61 = vmul.f32 1.442695, %v391_v60 }
 0x1c7   : > { %643 = vpow2.f32 %v392_v61 }
 0x1cd   : > { %v644_v62 = vpop.eup %643 }
 0x1ce   : > { %v394_v63 = vsel %vm387_vm0, %v644_v62, 0.0 }
 0x1cf   : > { %395 = vadd.xlane.f32.xlu0 %v394_v63 }
 0x242   : > { %v396_v3 = vpop.xlane.xlu0 %395 }
 0x243   : > { %645 = vrcp.f32 %v396_v3 }
 0x249   : > { %v646_v4 = vpop.eup %645 }
 0x24a   : > { %v398_v5 = vmul.f32 %v646_v4, %v644_v62 }
 0x24c   : > { %553 = vmatmul.msk.f32.vlgmr.msrb.gmra.mxu3 %vm387_vm0, %v398_v5 }
 0x2cf   : > { %v419_v6 = vpop.f32.mrf.mxu3 }
 0x2d0   : > { %422 = vst [vmem:[%s232_s18] sm:$0xff] %v419_v6 }
 0x2d1   : > { %764 = shalt.err (!%p761_p13)
}
 0x2d2   : > { %568 = dma.vmem_to_hbm [thread:$0]  (%p923_p0), %s438_s24, 128, %s440_s25, %s424_s26  }
 0x2d3 PF: > { %s451_s5 = sand.u32 1, %s803_s12   ;;  %p582_p2 = pnand %p545_p6, %p930_p5 }
 0x2d4   : > { %s452_s8 = scalar_lea.sflag [#allocation5], %s451_s5 }
 0x2d5   : > { %p583_p4 = pneg %p582_p2 }
 0x2d7   : > { %798 = dma.done.wait (%p583_p4), %s452_s8, 128  }
 0x2d8   : > { %800 = vsyncadd (%p583_p4), %s452_s8, 4294967168  ;;  %s20_s17 = sadd.s32 1, %s823_s17   ;;  %s1012_s12 = smov %s807_s13 }
 0x2d9   : > { %p17_p7 = scmp.ge.s32.totalorder %s20_s17, 4   ;;  %s1013_s13 = smov %s811_s14 }
 0x2da   : > { %s1014_s14 = smov %s928_s20  ;;  %s1015_s15 = smov %s819_s16 }
 0x2db   : > { %s1016_s16 = smov %s1018_s6  ;;  %19 = sbr.rel (!%p17_p7) target bundleno = 7 (0x7), region = 90 }
 0x2e0   :  { %458 = vsyncpa [#allocation4], 1 }
 0x2e1   :  { %460 = vsyncpa [#allocation4 + $0x1], 1 }
 0x2e2   :  { %461 = vsyncpa [#allocation7], 1 }
 0x2e3   :  { %462 = vsyncpa [#allocation5], 1 }
 0x2e4   :  { %464 = vsyncpa [#allocation5 + $0x1], 1 }

</bundles_post_ra>
